<compile_context>
chip_gen: v7x
topology: tpu7x:2x2x1
jax: 0.10.0
libtpu: 0.0.40
codegen_flags: <defaults>
</compile_context>

<pallas_src>
import functools

import jax
import jax.numpy as jnp
from jax import lax
from jax.experimental import pallas as pl
from jax.experimental.pallas import tpu as pltpu

_EPS = 1e-6  # torch.nn.functional.pairwise_distance default eps (added to the diff)


def _contrastive_loss_kernel(x1_ref, x2_ref, out_ref, acc_ref, *,
                             margin, indicator, n_valid, tn_rows, needs_mask):
    """x1_ref/x2_ref: (tn_rows, K) tiles in the original row-major layout.

    acc_ref: (1, 1) f32 SMEM accumulator, persistent across the row-tile grid.
    out_ref: (1, 1) f32 scalar output in SMEM.
    """
    i = pl.program_id(0)
    nprog = pl.num_programs(0)

    @pl.when(i == 0)
    def _():
        acc_ref[0, 0] = 0.0

    x1 = x1_ref[...].astype(jnp.float32)            # (tn_rows, K)
    x2 = x2_ref[...].astype(jnp.float32)
    diff = (x1 - x2) + _EPS                         # pairwise_distance adds eps to diff
    sq_sum = jnp.sum(diff * diff, axis=-1, keepdims=True)   # (tn_rows, 1)

    if indicator == 0:
        # dist**2 == sq_sum: skip the sqrt entirely (faster, one fewer rounding).
        per_row = sq_sum
    else:  # indicator == 1
        dist = jnp.sqrt(sq_sum)
        hinge = jnp.maximum(jnp.float32(margin) - dist, 0.0)
        per_row = hinge * hinge

    if needs_mask:
        # Only the ragged last tile needs the select; full tiles skip it.
        @pl.when(i < nprog - 1)
        def _():
            acc_ref[0, 0] += jnp.sum(per_row)

        @pl.when(i == nprog - 1)
        def _():
            row = lax.broadcasted_iota(jnp.int32, per_row.shape, 0) + i * tn_rows
            # Select (not multiply) so garbage/NaN in out-of-bounds rows is discarded.
            masked = jnp.where(row < n_valid, per_row, 0.0)
            acc_ref[0, 0] += jnp.sum(masked)
    else:
        acc_ref[0, 0] += jnp.sum(per_row)

    @pl.when(i == nprog - 1)
    def _():
        out_ref[0, 0] = acc_ref[0, 0] * (1.0 / float(n_valid))


def contrastive_loss(output1, output2, indicator, margin=200.0,
                     max_rows_per_tile=4096):
    """Pallas implementation of ContrastiveLoss.forward.

    `indicator` is a static Python int (0 or 1), matching the PyTorch module
    which branches (and raises) at call time.  Inputs are consumed in their
    natural (N, K) layout; no wrapper-side transpose / pad / reshape.
    """
    if indicator not in (0, 1):
        raise KeyError(
            f"The indicator can only be 0 or 1, in this instance got {indicator}"
        )
    assert output1.shape == output2.shape and output1.ndim == 2
    N, K = output1.shape

    if N <= max_rows_per_tile:
        tn_rows = N                     # single full-extent block
    else:
        tn_rows = max(8, max_rows_per_tile - (max_rows_per_tile % 8))
    n_tiles = pl.cdiv(N, tn_rows)
    needs_mask = (n_tiles > 1) and (N % tn_rows != 0)

    kernel = functools.partial(
        _contrastive_loss_kernel,
        margin=float(margin),
        indicator=int(indicator),
        n_valid=int(N),
        tn_rows=int(tn_rows),
        needs_mask=bool(needs_mask),
    )

    out = pl.pallas_call(
        kernel,
        grid=(n_tiles,),
        in_specs=[
            pl.BlockSpec((tn_rows, K), lambda i: (i, 0)),
            pl.BlockSpec((tn_rows, K), lambda i: (i, 0)),
        ],
        out_specs=pl.BlockSpec(memory_space=pltpu.SMEM),
        out_shape=jax.ShapeDtypeStruct((1, 1), jnp.float32),
        scratch_shapes=[pltpu.SMEM((1, 1), jnp.float32)],
        compiler_params=pltpu.CompilerParams(
            dimension_semantics=("arbitrary",)),
    )(output1, output2)
    return out[0, 0]


def _reference_loss(output1, output2, indicator, margin=200.0):
    # Pure-JAX reference mirroring the PyTorch semantics.
    diff = output1.astype(jnp.float32) - output2.astype(jnp.float32) + _EPS
    dist = jnp.sqrt(jnp.sum(diff * diff, axis=-1, keepdims=True))
    if indicator == 0:
        return jnp.mean(dist ** 2)
    return jnp.mean(jnp.maximum(margin - dist, 0.0) ** 2)


if __name__ == "__main__":
    # Module docstring says inputs are (80 x 3).
    key = jax.random.PRNGKey(0)
    k1, k2 = jax.random.split(key)
    output1 = jax.random.normal(k1, (80, 3), dtype=jnp.float32) * 5.0
    output2 = jax.random.normal(k2, (80, 3), dtype=jnp.float32) * 5.0

    ok = True
    for indicator in (0, 1):
        loss = jax.block_until_ready(
            contrastive_loss(output1, output2, indicator, margin=200.0))
        ref = _reference_loss(output1, output2, indicator, margin=200.0)
        if not jnp.allclose(loss, ref, rtol=1e-5, atol=1e-5):
            ok = False
            print(f"MISMATCH indicator={indicator}: kernel={loss} ref={ref}")

    # Also exercise the multi-tile + ragged-last-tile path (still tiny shapes).
    k3, k4 = jax.random.split(k2)
    big1 = jax.random.normal(k3, (200, 3), dtype=jnp.float32) * 3.0
    big2 = jax.random.normal(k4, (200, 3), dtype=jnp.float32) * 3.0
    for indicator in (0, 1):
        loss = jax.block_until_ready(
            contrastive_loss(big1, big2, indicator, margin=5.0,
                             max_rows_per_tile=64))
        ref = _reference_loss(big1, big2, indicator, margin=5.0)
        if not jnp.allclose(loss, ref, rtol=1e-5, atol=1e-5):
            ok = False
            print(f"MISMATCH (tiled) indicator={indicator}: kernel={loss} ref={ref}")

    if ok:
        print("KERNEL_OK")
</pallas_src>

<mosaic_0001>
module attributes {stable_mosaic.version = 11 : i64} {
  func.func @_contrastive_loss_kernel(%arg0: i32, %arg1: memref<80x3xf32, #tpu.memory_space<vmem>>, %arg2: memref<80x3xf32, #tpu.memory_space<vmem>>, %arg3: memref<1x1xf32, #tpu.memory_space<smem>>, %arg4: memref<1x1xf32, #tpu.memory_space<smem>>) attributes {dimension_semantics = [#tpu.dimension_semantics<arbitrary>], iteration_bounds = array<i64: 1>, scalar_prefetch = 0 : i64, scratch_operands = 1 : i64, tpu.core_type = #tpu.core_type<tc>, window_params = [{transform_indices = @transform_0, window_bounds = array<i64: 80, 3>}, {transform_indices = @transform_1, window_bounds = array<i64: 80, 3>}, {transform_indices = @transform_2, window_bounds = array<i64: 1, 1>}]} {
    %c0_i32 = arith.constant 0 : i32
    %0 = arith.cmpi eq, %arg0, %c0_i32 : i32
    %1 = arith.extui %0 : i1 to i32
    %c0_i32_0 = arith.constant 0 : i32
    %2 = arith.cmpi ne, %1, %c0_i32_0 : i32
    scf.if %2 {
      %cst_12 = arith.constant 0.000000e+00 : f32
      %c0_13 = arith.constant 0 : index
      %c0_14 = arith.constant 0 : index
      %21 = memref.load %arg4[%c0_13, %c0_14] : memref<1x1xf32, #tpu.memory_space<smem>>
      memref.store %cst_12, %arg4[%c0_13, %c0_14] : memref<1x1xf32, #tpu.memory_space<smem>>
    } else {
    }
    %c0 = arith.constant 0 : index
    %c0_1 = arith.constant 0 : index
    %3 = vector.load %arg1[%c0, %c0_1] : memref<80x3xf32, #tpu.memory_space<vmem>>, vector<80x3xf32>
    %c0_2 = arith.constant 0 : index
    %c0_3 = arith.constant 0 : index
    %4 = vector.load %arg2[%c0_2, %c0_3] : memref<80x3xf32, #tpu.memory_space<vmem>>, vector<80x3xf32>
    %5 = arith.subf %3, %4 : vector<80x3xf32>
    %cst = arith.constant 9.99999997E-7 : f32
    %6 = vector.broadcast %cst : f32 to vector<80x3xf32>
    %7 = arith.addf %5, %6 : vector<80x3xf32>
    %8 = arith.mulf %7, %7 : vector<80x3xf32>
    %cst_4 = arith.constant dense<0.000000e+00> : vector<80xf32>
    %9 = vector.multi_reduction <add>, %8, %cst_4 [1] : vector<80x3xf32> to vector<80xf32>
    %10 = vector.shape_cast %9 : vector<80xf32> to vector<80x1xf32>
    %c0_5 = arith.constant 0 : index
    %c0_6 = arith.constant 0 : index
    %11 = memref.load %arg4[%c0_5, %c0_6] : memref<1x1xf32, #tpu.memory_space<smem>>
    %12 = vector.shape_cast %10 : vector<80x1xf32> to vector<1x80x1xf32>
    %cst_7 = arith.constant dense<0.000000e+00> : vector<1xf32>
    %13 = vector.multi_reduction <add>, %12, %cst_7 [1, 2] : vector<1x80x1xf32> to vector<1xf32>
    %14 = vector.shape_cast %13 : vector<1xf32> to vector<1x1x1xf32>
    %15 = vector.extract %14[0, 0, 0] : f32 from vector<1x1x1xf32>
    %16 = arith.addf %11, %15 : f32
    %c0_8 = arith.constant 0 : index
    %c0_9 = arith.constant 0 : index
    %17 = memref.load %arg4[%c0_8, %c0_9] : memref<1x1xf32, #tpu.memory_space<smem>>
    memref.store %16, %arg4[%c0_8, %c0_9] : memref<1x1xf32, #tpu.memory_space<smem>>
    %c0_i32_10 = arith.constant 0 : i32
    %18 = arith.cmpi eq, %arg0, %c0_i32_10 : i32
    %19 = arith.extui %18 : i1 to i32
    %c0_i32_11 = arith.constant 0 : i32
    %20 = arith.cmpi ne, %19, %c0_i32_11 : i32
    scf.if %20 {
      %c0_12 = arith.constant 0 : index
      %c0_13 = arith.constant 0 : index
      %21 = memref.load %arg4[%c0_12, %c0_13] : memref<1x1xf32, #tpu.memory_space<smem>>
      %cst_14 = arith.constant 1.250000e-02 : f32
      %22 = arith.mulf %21, %cst_14 : f32
      %c0_15 = arith.constant 0 : index
      %c0_16 = arith.constant 0 : index
      %23 = memref.load %arg3[%c0_15, %c0_16] : memref<1x1xf32, #tpu.memory_space<smem>>
      memref.store %22, %arg3[%c0_15, %c0_16] : memref<1x1xf32, #tpu.memory_space<smem>>
    } else {
    }
    return
  }
  func.func @transform_0(%arg0: i32) -> (i32, i32) {
    %c0_i32 = arith.constant 0 : i32
    %c0_i32_0 = arith.constant 0 : i32
    return %arg0, %c0_i32 : i32, i32
  }
  func.func @transform_1(%arg0: i32) -> (i32, i32) {
    %c0_i32 = arith.constant 0 : i32
    %c0_i32_0 = arith.constant 0 : i32
    return %arg0, %c0_i32 : i32, i32
  }
  func.func @transform_2(%arg0: i32) -> (i32, i32) {
    %c0_i32 = arith.constant 0 : i32
    %c0_i32_0 = arith.constant 0 : i32
    %c0_i32_1 = arith.constant 0 : i32
    return %c0_i32, %c0_i32_0 : i32, i32
  }
}

</mosaic_0001>

<bundles_post_ra>
// kernel: tpu_custom_call.1
= control target key start
LH: loop header
LB: loop body
LE: loop exit
PB: predicated region body
PF: predicated region fallthrough
CT: control target
= control target key end

     0   :  { %vm68_vm0 = vcmask 23552   ;;  %s275_s0 = inlined_call_operand.vmem [shape: f32[80,3], index: 0, kind: input, shape index: {}]   ;;  %s276_s1 = inlined_call_operand.vmem [shape: f32[80,3], index: 1, kind: input, shape index: {}]   ;;  %s277_s2 = inlined_call_operand.hbm [shape: f32[1,1], index: 2, kind: output, shape index: {}]  }
   0x1   :  { %v18_v0 = vld [vmem:[%s275_s0] sm:$0xff]  ;;  %v20_v2 = vld [vmem:[%s275_s0 + $0x10] sm:$0xff]  ;;  %v19_v5 = vld [vmem:[%s275_s0 + $0x8] sm:$0xff] }
   0x2   :  { %v28_v1 = vld [vmem:[%s276_s1] sm:$0xff]  ;;  %v30_v4 = vld [vmem:[%s276_s1 + $0x10] sm:$0xff]  ;;  %v29_v6 = vld [vmem:[%s276_s1 + $0x8] sm:$0xff] }
   0x3   :  { %v38_v3 = vsub.f32 %v18_v0, %v28_v1  ;;  %v40_v7 = vsub.f32 %v20_v2, %v30_v4  ;;  %v39_v8 = vsub.f32 %v19_v5, %v29_v6  ;;  %v21_v9 = vld [vmem:[%s275_s0 + $0x18] sm:$0xff]  ;;  %v22_v11 = vld [vmem:[%s275_s0 + $0x20] sm:$0xff]  ;;  %v23_v15 = vld [vmem:[%s275_s0 + $0x28] sm:$0xff] }
   0x4   :  { %v31_v10 = vld [vmem:[%s276_s1 + $0x18] sm:$0xff]  ;;  %v32_v14 = vld [vmem:[%s276_s1 + $0x20] sm:$0xff]  ;;  %v33_v16 = vld [vmem:[%s276_s1 + $0x28] sm:$0xff] }
   0x5   :  { %v48_v12 = vadd.f32 1e-06, %v38_v3  ;;  %v41_v13 = vsub.f32 %v21_v9, %v31_v10  ;;  %v50_v17 = vadd.f32 1e-06, %v40_v7  ;;  %v49_v18 = vadd.f32 1e-06, %v39_v8 }
   0x6   :  { %v42_v19 = vsub.f32 %v22_v11, %v32_v14  ;;  %v43_v20 = vsub.f32 %v23_v15, %v33_v16  ;;  %v24_v21 = vld [vmem:[%s275_s0 + $0x30] sm:$0xff]  ;;  %v25_v26 = vld [vmem:[%s275_s0 + $0x38] sm:$0xff]  ;;  %v26_v32 = vld [vmem:[%s275_s0 + $0x40] sm:$0xff] }
   0x7   :  { %v34_v22 = vld [vmem:[%s276_s1 + $0x30] sm:$0xff]  ;;  %v58_v23 = vmul.f32 %v48_v12, %v48_v12  ;;  %v51_v24 = vadd.f32 1e-06, %v41_v13  ;;  %v35_v27 = vld [vmem:[%s276_s1 + $0x38] sm:$0xff]  ;;  %v60_v28 = vmul.f32 %v50_v17, %v50_v17  ;;  %v59_v29 = vmul.f32 %v49_v18, %v49_v18  ;;  %v36_v33 = vld [vmem:[%s276_s1 + $0x40] sm:$0xff] }
   0x8   :  { %v44_v25 = vsub.f32 %v24_v21, %v34_v22  ;;  %v52_v30 = vadd.f32 1e-06, %v42_v19  ;;  %v53_v31 = vadd.f32 1e-06, %v43_v20  ;;  %v45_v36 = vsub.f32 %v25_v26, %v35_v27  ;;  %v27_v37 = vld [vmem:[%s275_s0 + $0x48] sm:$0xff] }
   0x9   :  { %v69_v34 = vsel %vm68_vm0, %v58_v23, 0.0  ;;  %v61_v35 = vmul.f32 %v51_v24, %v51_v24  ;;  %v37_v38 = vld [vmem:[%s276_s1 + $0x48] sm:$0xff] }
   0xa   :  { %7 = vsyncpa [#allocation4], 0  ;;  %70 = vadd.xlane.f32.xlu0 %v69_v34  ;;  %v75_v39 = vsel %vm68_vm0, %v60_v28, 0.0  ;;  %v72_v40 = vsel %vm68_vm0, %v59_v29, 0.0  ;;  %v62_v41 = vmul.f32 %v52_v30, %v52_v30  ;;  %v54_v42 = vadd.f32 1e-06, %v44_v25 }
   0xb   :  { %76 = vadd.xlane.f32.xlu1 %v75_v39  ;;  %v46_v43 = vsub.f32 %v26_v32, %v36_v33  ;;  %v78_v44 = vsel %vm68_vm0, %v61_v35, 0.0  ;;  %v63_v45 = vmul.f32 %v53_v31, %v53_v31  ;;  %v55_v46 = vadd.f32 1e-06, %v45_v36  ;;  %s155_s23 = scalar_lea.hbm %s277_s2, 16 }
   0xc   :  { %v47_v47 = vsub.f32 %v27_v37, %v37_v38  ;;  %v81_v48 = vsel %vm68_vm0, %v62_v41, 0.0  ;;  %v64_v49 = vmul.f32 %v54_v42, %v54_v42  ;;  %vm100_vm1 = vcmask 7168   ;;  %p156_p0 = scmp.ne.s32.totalorder %s277_s2, %s155_s23  ;;  %p159_p1 = scmp.lt.u32.totalorder %s155_s23, %s277_s2 }
   0xd   :  { %v56_v50 = vadd.f32 1e-06, %v46_v43  ;;  %v84_v51 = vsel %vm68_vm0, %v63_v45, 0.0  ;;  %v65_v52 = vmul.f32 %v55_v46, %v55_v46 }
   0xe   :  { %73 = vadd.xlane.f32.xlu0 %v72_v40  ;;  %v57_v53 = vadd.f32 1e-06, %v47_v47  ;;  %v87_v54 = vsel %vm68_vm0, %v64_v49, 0.0  ;;  %p161_p2 = pnand %p159_p1, %p156_p0 }
   0xf   :  { %79 = vadd.xlane.f32.xlu1 %v78_v44  ;;  %v66_v55 = vmul.f32 %v56_v50, %v56_v50  ;;  %v90_v56 = vsel %vm68_vm0, %v65_v52, 0.0 }
  0x10   :  { %v67_v57 = vmul.f32 %v57_v53, %v57_v53 }
  0x11   :  { %v93_v58 = vsel %vm68_vm0, %v66_v55, 0.0 }
  0x12   :  { %82 = vadd.xlane.f32.xlu0 %v81_v48  ;;  %v96_v59 = vsel %vm68_vm0, %v67_v57, 0.0 }
  0x13   :  { %85 = vadd.xlane.f32.xlu1 %v84_v51 }
  0x16   :  { %88 = vadd.xlane.f32.xlu0 %v87_v54 }
  0x17   :  { %91 = vadd.xlane.f32.xlu1 %v90_v56 }
  0x1a   :  { %94 = vadd.xlane.f32.xlu0 %v93_v58 }
  0x1b   :  { %97 = vadd.xlane.f32.xlu1 %v96_v59 }
  0x97   :  { %v71_v60 = vpop.xlane.xlu0 %70 }
  0x98   :  { %v77_v61 = vpop.xlane.xlu1 %76  ;;  %v101_v63 = vsel %vm100_vm1, %v71_v60, 0.0 }
  0x99   :  { %v104_v3 = vsel %vm100_vm1, %v77_v61, 0.0 }
  0x9b   :  { %v74_v62 = vpop.xlane.xlu0 %73 }
  0x9c   :  { %v102_v0 = vsel %vm100_vm1, %v74_v62, 0.0  ;;  %v80_v1 = vpop.xlane.xlu1 %79 }
  0x9d   :  { %v103_v2 = vadd.f32 %v102_v0, %v101_v63  ;;  %v106_v4 = vsel %vm100_vm1, %v80_v1, 0.0 }
  0x9f   :  { %v105_v5 = vadd.f32 %v104_v3, %v103_v2  ;;  %v83_v6 = vpop.xlane.xlu0 %82 }
  0xa0   :  { %v108_v7 = vsel %vm100_vm1, %v83_v6, 0.0  ;;  %v86_v8 = vpop.xlane.xlu1 %85 }
  0xa1   :  { %v107_v9 = vadd.f32 %v106_v4, %v105_v5  ;;  %v110_v10 = vsel %vm100_vm1, %v86_v8, 0.0 }
  0xa3   :  { %v109_v11 = vadd.f32 %v108_v7, %v107_v9  ;;  %v89_v12 = vpop.xlane.xlu0 %88 }
  0xa4   :  { %v112_v13 = vsel %vm100_vm1, %v89_v12, 0.0  ;;  %v92_v14 = vpop.xlane.xlu1 %91 }
  0xa5   :  { %v111_v15 = vadd.f32 %v110_v10, %v109_v11  ;;  %v114_v16 = vsel %vm100_vm1, %v92_v14, 0.0 }
  0xa7   :  { %v113_v17 = vadd.f32 %v112_v13, %v111_v15  ;;  %v95_v18 = vpop.xlane.xlu0 %94 }
  0xa8   :  { %v116_v19 = vsel %vm100_vm1, %v95_v18, 0.0  ;;  %v98_v20 = vpop.xlane.xlu1 %97 }
  0xa9   :  { %v115_v21 = vadd.f32 %v114_v16, %v113_v17  ;;  %v118_v22 = vsel %vm100_vm1, %v98_v20, 0.0 }
  0xab   :  { %v117_v23 = vadd.f32 %v116_v19, %v115_v21 }
  0xad   :  { %v119_v24 = vadd.f32 %v118_v22, %v117_v23 }
  0xaf   :  { %120 = vadd.xlane.f32.xlu0 %v119_v24 }
 0x13c   :  { %v121_v25 = vpop.xlane.xlu0 %120 }
 0x13d   :  { %v122_v26 = vrot.slane %v121_v25, 4 }
 0x13f   :  { %v123_v27 = vadd.f32 %v122_v26, %v121_v25 }
 0x141   :  { %v124_v28 = vrot.slane %v123_v27, 2 }
 0x143   :  { %v125_v29 = vadd.f32 %v124_v28, %v123_v27 }
 0x145   :  { %v126_v30 = vrot.slane %v125_v29, 1 }
 0x147   :  { %v127_v31 = vadd.f32 %v126_v30, %v125_v29 }
 0x149   :  { %152 = vpush %v127_v31 }
 0x17a   :  { %s153_s0 = spop %152 }
 0x17b   :  { %s136_s1 = smul.f32 0.0125, %s153_s0 }
 0x17d   :  { %138 = sst [smem:[#allocation3]] %s136_s1 }
 0x17e   :  { %164 = shalt.err (!%p161_p2)
}
 0x17f   :  { %s167_s28 = smov [#allocation3]  }
 0x180   :  { %146 = dma.smem_to_hbm %s167_s28, 16, %s277_s2, [#allocation4]  }
 0x181   :  { %165 = dma.done.wait [#allocation4], 16  }
 0x182   :  { %166 = vsyncadd [#allocation4], 4294967280 }
 0x183   :  { %150 = sfence }
 0x184   :  { %151 = vsyncpa [#allocation4], 1 }

</bundles_post_ra>
